<compile_context>
chip_gen: v7x
topology: tpu7x:2x2x1
jax: 0.10.0
libtpu: 0.0.40
codegen_flags: <defaults>
</compile_context>

<pallas_src>
import jax
import jax.numpy as jnp
import numpy as np
from jax.experimental import pallas as pl
from jax.experimental.pallas import tpu as pltpu

LANE = 128
SUBLANE = 8


def rgcn_kernel(a_ref, x_ref, w1_ref, b1_ref, w2_ref, b2_ref, p_ref, out_ref):
    f32 = jnp.float32
    a = a_ref[...]                       # [2N, N]  rows 0:N = relation 0, N:2N = relation 1
    x = x_ref[...]                       # [N, Fp]
    cd = x.dtype                         # compute dtype for MXU inputs (bf16)
    n = x.shape[0]

    # ---- RGCNConv layer 1: stacked mean-aggregation + fused (relation, relation, root) matmul
    m = jnp.dot(a, x, preferred_element_type=f32)                              # [2N, Fp]
    z1 = jnp.concatenate([m[:n].astype(cd), m[n:].astype(cd), x], axis=-1)     # [N, 3Fp]
    h1 = jnp.dot(z1, w1_ref[...], preferred_element_type=f32) + b1_ref[...]
    h1 = jnp.maximum(h1, 0.0)                                                  # f32 [N, Hp]

    # ---- RGCNConv layer 2
    h1c = h1.astype(cd)
    m2 = jnp.dot(a, h1c, preferred_element_type=f32)                           # [2N, Hp]
    z2 = jnp.concatenate([m2[:n].astype(cd), m2[n:].astype(cd), h1c], axis=-1) # [N, 3Hp]
    h2 = jnp.dot(z2, w2_ref[...], preferred_element_type=f32) + b2_ref[...]
    h2 = jnp.maximum(h2, 0.0)                                                  # f32 [N, Hp]

    # ---- global_mean_pool -> lane-dense [Gp, Hp] output (hidden->1 fc runs in the wrapper)
    out_ref[...] = jnp.dot(p_ref[...], h2.astype(cd), preferred_element_type=f32)


def _round_up(v, m):
    return ((v + m - 1) // m) * m


def _pack_operands(a0, a1, x, params, pool_mat, compute_dtype):
    """Pad to TPU-friendly shapes and fuse per-relation/root weights (wrapper-side plumbing)."""
    (w01, w11, r1, b1, w02, w12, r2, b2, _wfc, _bfc) = params
    N, F = x.shape
    H = w01.shape[1]
    G = pool_mat.shape[0]
    Np = _round_up(N, SUBLANE)
    Fp = _round_up(F, LANE)
    Hp = _round_up(H, LANE)
    Gp = _round_up(G, SUBLANE)

    # Stacked relation-aggregation matrix [2Np, Np]
    a = jnp.zeros((2 * Np, Np), jnp.float32)
    a = a.at[:N, :N].set(a0).at[Np:Np + N, :N].set(a1).astype(compute_dtype)

    xp = jnp.zeros((Np, Fp), jnp.float32).at[:N, :F].set(x).astype(compute_dtype)

    def fuse(ws, in_dim, in_pad):
        w = jnp.zeros((3 * in_pad, Hp), jnp.float32)
        for k, wk in enumerate(ws):
            w = w.at[k * in_pad:k * in_pad + in_dim, :H].set(wk)
        return w.astype(compute_dtype)

    w1 = fuse((w01, w11, r1), F, Fp)     # [3*Fp, Hp]
    w2 = fuse((w02, w12, r2), H, Hp)     # [3*Hp, Hp]
    b1p = jnp.zeros((1, Hp), jnp.float32).at[:, :H].set(b1)
    b2p = jnp.zeros((1, Hp), jnp.float32).at[:, :H].set(b2)
    pp = jnp.zeros((Gp, Np), jnp.float32).at[:G, :N].set(pool_mat).astype(compute_dtype)
    return (a, xp, w1, b1p, w2, b2p, pp), (G, Gp, H, Hp)


def rgcn_forward_pallas(a0, a1, x, params, pool_mat, *, compute_dtype=jnp.bfloat16):
    wfc, bfc = params[8], params[9]
    operands, (G, Gp, H, Hp) = _pack_operands(a0, a1, x, params, pool_mat, compute_dtype)

    def full_spec(shape):
        return pl.BlockSpec(shape, lambda i: (0,) * len(shape))

    pooled_pad = pl.pallas_call(
        rgcn_kernel,
        out_shape=jax.ShapeDtypeStruct((Gp, Hp), jnp.float32),
        grid=(1,),
        in_specs=[full_spec(t.shape) for t in operands],
        out_specs=full_spec((Gp, Hp)),
        compiler_params=pltpu.CompilerParams(
            dimension_semantics=("arbitrary",),
            vmem_limit_bytes=32 * 1024 * 1024),
    )(*operands)

    pooled = pooled_pad[:G, :H]                     # global_mean_pool output
    return (pooled @ wfc + bfc).reshape(-1)         # fc(hidden -> 1), then x.view(-1)


def rgcn_forward_ref(a0, a1, x, params, pool_mat, compute_dtype=jnp.float32):
    """Plain-JAX reference with the same cast-at-dot-boundary scheme as the kernel."""
    (w01, w11, r1, b1, w02, w12, r2, b2, wfc, bfc) = params
    cd = compute_dtype

    def dot(lhs, rhs):
        return jnp.dot(lhs.astype(cd), rhs.astype(cd), preferred_element_type=jnp.float32)

    h1 = jnp.maximum(dot(dot(a0, x), w01) + dot(dot(a1, x), w11) + dot(x, r1) + b1, 0.0)
    h2 = jnp.maximum(dot(dot(a0, h1), w02) + dot(dot(a1, h1), w12) + dot(h1, r2) + b2, 0.0)
    pooled = dot(pool_mat, h2)
    return (pooled @ wfc + bfc).reshape(-1)


def build_graph_operators(edge_index, edge_type, batch_vec, num_nodes, num_rel, num_graphs):
    """Dense per-relation mean-aggregation matrices and mean-pool matrix (plain-JAX glue)."""
    src, dst = edge_index[0], edge_index[1]
    adj = jnp.zeros((num_rel, num_nodes, num_nodes), jnp.float32)
    adj = adj.at[edge_type, dst, src].add(1.0)          # A_r[i, j] = #edges j->i of type r
    deg = adj.sum(axis=-1, keepdims=True)               # in-degree per relation
    adj = adj / jnp.maximum(deg, 1.0)                   # scatter_mean (0-degree rows stay 0)

    onehot = (batch_vec[None, :] == jnp.arange(num_graphs)[:, None]).astype(jnp.float32)
    counts = onehot.sum(axis=-1, keepdims=True)
    pool_mat = onehot / jnp.maximum(counts, 1.0)        # global_mean_pool
    return adj[0], adj[1], pool_mat


def init_params(key, input_size, hidden_size):
    ks = jax.random.split(key, 10)

    def g(k, shape, fan_in):
        return (jax.random.normal(k, shape, jnp.float32) / np.sqrt(fan_in)).astype(jnp.float32)

    w01 = g(ks[0], (input_size, hidden_size), input_size)   # relation-0 weight, layer 1
    w11 = g(ks[1], (input_size, hidden_size), input_size)   # relation-1 weight, layer 1
    r1 = g(ks[2], (input_size, hidden_size), input_size)    # root weight, layer 1
    b1 = g(ks[3], (1, hidden_size), hidden_size)            # bias, layer 1
    w02 = g(ks[4], (hidden_size, hidden_size), hidden_size)
    w12 = g(ks[5], (hidden_size, hidden_size), hidden_size)
    r2 = g(ks[6], (hidden_size, hidden_size), hidden_size)
    b2 = g(ks[7], (1, hidden_size), hidden_size)
    wfc = g(ks[8], (hidden_size, 1), hidden_size)            # nn.Linear(hidden, 1) weight^T
    bfc = g(ks[9], (1, 1), 1)                                 # nn.Linear bias
    return (w01, w11, r1, b1, w02, w12, r2, b2, wfc, bfc)


if __name__ == "__main__":
    key = jax.random.PRNGKey(0)
    input_size, hidden_size = 16, 32
    num_nodes, num_graphs, num_edges = 16, 2, 32

    k_feat, k_s0, k_d0, k_s1, k_d1, k_typ, k_par = jax.random.split(key, 7)

    # Node features (batch.x) and graph assignment (batch.batch): nodes 0-7 -> g0, 8-15 -> g1
    x = jax.random.normal(k_feat, (num_nodes, input_size), jnp.float32)
    batch_vec = jnp.concatenate([jnp.zeros(8, jnp.int32), jnp.ones(8, jnp.int32)])

    # Edges stay within each graph; edge_type (batch.edge_attr) in {0, 1}
    half = num_edges // 2
    src = jnp.concatenate([jax.random.randint(k_s0, (half,), 0, 8),
                           jax.random.randint(k_s1, (half,), 8, 16)])
    dst = jnp.concatenate([jax.random.randint(k_d0, (half,), 0, 8),
                           jax.random.randint(k_d1, (half,), 8, 16)])
    edge_index = jnp.stack([src, dst]).astype(jnp.int32)
    edge_type = jax.random.randint(k_typ, (num_edges,), 0, 2).astype(jnp.int32)

    a0, a1, pool_mat = build_graph_operators(
        edge_index, edge_type, batch_vec, num_nodes, 2, num_graphs)
    params = init_params(k_par, input_size, hidden_size)

    out = jax.block_until_ready(rgcn_forward_pallas(a0, a1, x, params, pool_mat))

    # Check against a reference with the same bf16-at-dot-boundaries precision (tight), and
    # against the pure-f32 math (loose, covers bf16 rounding).
    ref_bf16 = rgcn_forward_ref(a0, a1, x, params, pool_mat, jnp.bfloat16)
    np.testing.assert_allclose(np.asarray(out), np.asarray(ref_bf16), rtol=1e-4, atol=1e-4)
    ref_f32 = rgcn_forward_ref(a0, a1, x, params, pool_mat, jnp.float32)
    np.testing.assert_allclose(np.asarray(out), np.asarray(ref_f32), rtol=1e-1, atol=1e-1)

    print("KERNEL_OK")
</pallas_src>

<mosaic_0001>
module attributes {stable_mosaic.version = 11 : i64} {
  func.func @rgcn_kernel(%arg0: i32, %arg1: memref<32x16xbf16, #tpu.memory_space<vmem>>, %arg2: memref<16x128xbf16, #tpu.memory_space<vmem>>, %arg3: memref<384x128xbf16, #tpu.memory_space<vmem>>, %arg4: memref<1x128xf32, #tpu.memory_space<vmem>>, %arg5: memref<384x128xbf16, #tpu.memory_space<vmem>>, %arg6: memref<1x128xf32, #tpu.memory_space<vmem>>, %arg7: memref<8x16xbf16, #tpu.memory_space<vmem>>, %arg8: memref<8x128xf32, #tpu.memory_space<vmem>>) attributes {dimension_semantics = [#tpu.dimension_semantics<arbitrary>], iteration_bounds = array<i64: 1>, scalar_prefetch = 0 : i64, scratch_operands = 0 : i64, tpu.core_type = #tpu.core_type<tc>, window_params = [{pipeline_mode = #tpu.pipeline_mode<synchronous>, transform_indices = @transform_0, window_bounds = array<i64: 32, 16>}, {pipeline_mode = #tpu.pipeline_mode<synchronous>, transform_indices = @transform_1, window_bounds = array<i64: 16, 128>}, {pipeline_mode = #tpu.pipeline_mode<synchronous>, transform_indices = @transform_2, window_bounds = array<i64: 384, 128>}, {pipeline_mode = #tpu.pipeline_mode<synchronous>, transform_indices = @transform_3, window_bounds = array<i64: 1, 128>}, {pipeline_mode = #tpu.pipeline_mode<synchronous>, transform_indices = @transform_4, window_bounds = array<i64: 384, 128>}, {pipeline_mode = #tpu.pipeline_mode<synchronous>, transform_indices = @transform_5, window_bounds = array<i64: 1, 128>}, {pipeline_mode = #tpu.pipeline_mode<synchronous>, transform_indices = @transform_6, window_bounds = array<i64: 8, 16>}, {pipeline_mode = #tpu.pipeline_mode<synchronous>, transform_indices = @transform_7, window_bounds = array<i64: 8, 128>}]} {
    %c0 = arith.constant 0 : index
    %c0_0 = arith.constant 0 : index
    %0 = vector.load %arg1[%c0, %c0_0] : memref<32x16xbf16, #tpu.memory_space<vmem>>, vector<32x16xbf16>
    %c0_1 = arith.constant 0 : index
    %c0_2 = arith.constant 0 : index
    %1 = vector.load %arg2[%c0_1, %c0_2] : memref<16x128xbf16, #tpu.memory_space<vmem>>, vector<16x128xbf16>
    %cst = arith.constant dense<0.000000e+00> : vector<32x128xf32>
    %2 = tpu.matmul %0, %1, %cst {dimension_numbers = #tpu.dot_dimension_numbers<[1], [0], [0], [1], [0, 0, 1, 1], [], []>} : vector<32x16xbf16>, vector<16x128xbf16>, vector<32x128xf32> -> vector<32x128xf32>
    %3 = vector.extract_strided_slice %2 {offsets = [0, 0], sizes = [16, 128], strides = [1, 1]} : vector<32x128xf32> to vector<16x128xf32>
    %4 = arith.truncf %3 : vector<16x128xf32> to vector<16x128xbf16>
    %5 = vector.extract_strided_slice %2 {offsets = [16, 0], sizes = [16, 128], strides = [1, 1]} : vector<32x128xf32> to vector<16x128xf32>
    %6 = arith.truncf %5 : vector<16x128xf32> to vector<16x128xbf16>
    %7 = tpu.concatenate %4, %6, %1 in 1 : vector<16x128xbf16>, vector<16x128xbf16>, vector<16x128xbf16> -> vector<16x384xbf16>
    %c0_3 = arith.constant 0 : index
    %c0_4 = arith.constant 0 : index
    %8 = vector.load %arg3[%c0_3, %c0_4] : memref<384x128xbf16, #tpu.memory_space<vmem>>, vector<384x128xbf16>
    %cst_5 = arith.constant dense<0.000000e+00> : vector<16x128xf32>
    %9 = tpu.matmul %7, %8, %cst_5 {dimension_numbers = #tpu.dot_dimension_numbers<[1], [0], [0], [1], [0, 0, 1, 1], [], []>} : vector<16x384xbf16>, vector<384x128xbf16>, vector<16x128xf32> -> vector<16x128xf32>
    %c0_6 = arith.constant 0 : index
    %c0_7 = arith.constant 0 : index
    %10 = vector.load %arg4[%c0_6, %c0_7] : memref<1x128xf32, #tpu.memory_space<vmem>>, vector<1x128xf32>
    %11 = vector.broadcast %10 : vector<1x128xf32> to vector<16x128xf32>
    %12 = arith.addf %9, %11 : vector<16x128xf32>
    %cst_8 = arith.constant 0.000000e+00 : f32
    %13 = vector.broadcast %cst_8 : f32 to vector<16x128xf32>
    %14 = arith.maximumf %12, %13 : vector<16x128xf32>
    %15 = arith.truncf %14 : vector<16x128xf32> to vector<16x128xbf16>
    %cst_9 = arith.constant dense<0.000000e+00> : vector<32x128xf32>
    %16 = tpu.matmul %0, %15, %cst_9 {dimension_numbers = #tpu.dot_dimension_numbers<[1], [0], [0], [1], [0, 0, 1, 1], [], []>} : vector<32x16xbf16>, vector<16x128xbf16>, vector<32x128xf32> -> vector<32x128xf32>
    %17 = vector.extract_strided_slice %16 {offsets = [0, 0], sizes = [16, 128], strides = [1, 1]} : vector<32x128xf32> to vector<16x128xf32>
    %18 = arith.truncf %17 : vector<16x128xf32> to vector<16x128xbf16>
    %19 = vector.extract_strided_slice %16 {offsets = [16, 0], sizes = [16, 128], strides = [1, 1]} : vector<32x128xf32> to vector<16x128xf32>
    %20 = arith.truncf %19 : vector<16x128xf32> to vector<16x128xbf16>
    %21 = tpu.concatenate %18, %20, %15 in 1 : vector<16x128xbf16>, vector<16x128xbf16>, vector<16x128xbf16> -> vector<16x384xbf16>
    %c0_10 = arith.constant 0 : index
    %c0_11 = arith.constant 0 : index
    %22 = vector.load %arg5[%c0_10, %c0_11] : memref<384x128xbf16, #tpu.memory_space<vmem>>, vector<384x128xbf16>
    %cst_12 = arith.constant dense<0.000000e+00> : vector<16x128xf32>
    %23 = tpu.matmul %21, %22, %cst_12 {dimension_numbers = #tpu.dot_dimension_numbers<[1], [0], [0], [1], [0, 0, 1, 1], [], []>} : vector<16x384xbf16>, vector<384x128xbf16>, vector<16x128xf32> -> vector<16x128xf32>
    %c0_13 = arith.constant 0 : index
    %c0_14 = arith.constant 0 : index
    %24 = vector.load %arg6[%c0_13, %c0_14] : memref<1x128xf32, #tpu.memory_space<vmem>>, vector<1x128xf32>
    %25 = vector.broadcast %24 : vector<1x128xf32> to vector<16x128xf32>
    %26 = arith.addf %23, %25 : vector<16x128xf32>
    %cst_15 = arith.constant 0.000000e+00 : f32
    %27 = vector.broadcast %cst_15 : f32 to vector<16x128xf32>
    %28 = arith.maximumf %26, %27 : vector<16x128xf32>
    %c0_16 = arith.constant 0 : index
    %c0_17 = arith.constant 0 : index
    %29 = vector.load %arg7[%c0_16, %c0_17] : memref<8x16xbf16, #tpu.memory_space<vmem>>, vector<8x16xbf16>
    %30 = arith.truncf %28 : vector<16x128xf32> to vector<16x128xbf16>
    %cst_18 = arith.constant dense<0.000000e+00> : vector<8x128xf32>
    %31 = tpu.matmul %29, %30, %cst_18 {dimension_numbers = #tpu.dot_dimension_numbers<[1], [0], [0], [1], [0, 0, 1, 1], [], []>} : vector<8x16xbf16>, vector<16x128xbf16>, vector<8x128xf32> -> vector<8x128xf32>
    %c0_19 = arith.constant 0 : index
    %c0_20 = arith.constant 0 : index
    %32 = vector.load %arg8[%c0_19, %c0_20] : memref<8x128xf32, #tpu.memory_space<vmem>>, vector<8x128xf32>
    tpu.vector_store %arg8[%c0_19, %c0_20], %31 {strides = array<i32>} : memref<8x128xf32, #tpu.memory_space<vmem>>, vector<8x128xf32>,
    return
  }
  func.func @transform_0(%arg0: i32) -> (i32, i32) {
    %c0_i32 = arith.constant 0 : i32
    %c0_i32_0 = arith.constant 0 : i32
    %c0_i32_1 = arith.constant 0 : i32
    return %c0_i32, %c0_i32_0 : i32, i32
  }
  func.func @transform_1(%arg0: i32) -> (i32, i32) {
    %c0_i32 = arith.constant 0 : i32
    %c0_i32_0 = arith.constant 0 : i32
    %c0_i32_1 = arith.constant 0 : i32
    return %c0_i32, %c0_i32_0 : i32, i32
  }
  func.func @transform_2(%arg0: i32) -> (i32, i32) {
    %c0_i32 = arith.constant 0 : i32
    %c0_i32_0 = arith.constant 0 : i32
    %c0_i32_1 = arith.constant 0 : i32
    return %c0_i32, %c0_i32_0 : i32, i32
  }
  func.func @transform_3(%arg0: i32) -> (i32, i32) {
    %c0_i32 = arith.constant 0 : i32
    %c0_i32_0 = arith.constant 0 : i32
    %c0_i32_1 = arith.constant 0 : i32
    return %c0_i32, %c0_i32_0 : i32, i32
  }
  func.func @transform_4(%arg0: i32) -> (i32, i32) {
    %c0_i32 = arith.constant 0 : i32
    %c0_i32_0 = arith.constant 0 : i32
    %c0_i32_1 = arith.constant 0 : i32
    return %c0_i32, %c0_i32_0 : i32, i32
  }
  func.func @transform_5(%arg0: i32) -> (i32, i32) {
    %c0_i32 = arith.constant 0 : i32
    %c0_i32_0 = arith.constant 0 : i32
    %c0_i32_1 = arith.constant 0 : i32
    return %c0_i32, %c0_i32_0 : i32, i32
  }
  func.func @transform_6(%arg0: i32) -> (i32, i32) {
    %c0_i32 = arith.constant 0 : i32
    %c0_i32_0 = arith.constant 0 : i32
    %c0_i32_1 = arith.constant 0 : i32
    return %c0_i32, %c0_i32_0 : i32, i32
  }
  func.func @transform_7(%arg0: i32) -> (i32, i32) {
    %c0_i32 = arith.constant 0 : i32
    %c0_i32_0 = arith.constant 0 : i32
    %c0_i32_1 = arith.constant 0 : i32
    return %c0_i32, %c0_i32_0 : i32, i32
  }
}

</mosaic_0001>

<bundles_post_ra>
// kernel: tpu_custom_call.1
= control target key start
LH: loop header
LB: loop body
LE: loop exit
PB: predicated region body
PF: predicated region fallthrough
CT: control target
= control target key end

     0   :  { %12 = vsyncpa [#allocation3], 0  ;;  %s1274_s0 = inlined_call_operand.vmem [shape: bf16[32,16], index: 0, kind: input, shape index: {}]   ;;  %s1275_s1 = inlined_call_operand.vmem [shape: bf16[16,128], index: 1, kind: input, shape index: {}]   ;;  %s1276_s2 = inlined_call_operand.hbm [shape: bf16[384,128], index: 2, kind: input, shape index: {}]   ;;  %s1277_s3 = inlined_call_operand.vmem [shape: f32[1,128], index: 3, kind: input, shape index: {}]   ;;  %s1278_s4 = inlined_call_operand.hbm [shape: bf16[384,128], index: 4, kind: input, shape index: {}]   ;;  %s1279_s5 = inlined_call_operand.vmem [shape: f32[1,128], index: 5, kind: input, shape index: {}]   ;;  %s1280_s6 = inlined_call_operand.vmem [shape: bf16[8,16], index: 6, kind: input, shape index: {}]   ;;  %s1281_s7 = inlined_call_operand.hbm [shape: f32[8,128], index: 7, kind: output, shape index: {}]  }
   0x1   :  { %13 = vsyncpa [#allocation6], 0 }
   0x2   :  { %14 = vsyncpa [#allocation4], 0  ;;  %s1132_s24 = smov [#allocation2]   ;;  %s1060_s28 = scalar_lea.hbm %s1276_s2, 3072 }
   0x3   :  { %s24_s25 = sshll.u32 %s1132_s24, 4  ;;  %p1061_p0 = scmp.ne.s32.totalorder %s1276_s2, %s1060_s28  ;;  %s25_s25 = int_to_ptr.vmem [resolvable:$true] %s24_s25 }
   0x4   :  { %p1064_p1 = scmp.lt.u32.totalorder %s1060_s28, %s1276_s2 }
   0x6   :  { %p1066_p2 = pnand %p1064_p1, %p1061_p0 }
   0x8   :  { %1069 = shalt.err (!%p1066_p2)
}
   0x9   :  { %s1070_s10 = scalar_lea.vmem %s25_s25, 3072  ;;  %p1075_p4 = scmp.lt.s32.totalorder %s25_s25, %s25_s25 }
   0xa   :  { %p1071_p3 = scmp.ne.s32.totalorder %s25_s25, %s1070_s10  ;;  %p1076_p5 = scmp.lt.s32.totalorder %s1070_s10, %s1070_s10 }
   0xc   :  { %p1077_p6 = por %p1076_p5, %p1075_p4 }
   0xe   :  { %p1078_p7 = pnand %p1077_p6, %p1071_p3 }
  0x10   :  { %1081 = shalt.err (!%p1078_p7)
}
  0x11   :  { %s1133_s11 = smov 64   ;;  %s1134_s12 = smov 4  }
  0x12   :  { %30 = dma.hbm_to_vmem [thread:$0]  %s1276_s2, 3072, %s25_s25, [#allocation3], %s1133_s11, %s1133_s11, %s1134_s12  }
  0x13   :  { %s1135_s15 = smov [#allocation5]   ;;  %s1082_s19 = scalar_lea.hbm %s1278_s4, 3072 }
  0x14   :  { %s38_s16 = sshll.u32 %s1135_s15, 4  ;;  %p1083_p8 = scmp.ne.s32.totalorder %s1278_s4, %s1082_s19  ;;  %s39_s16 = int_to_ptr.vmem [resolvable:$true] %s38_s16 }
  0x15   :  { %p1086_p9 = scmp.lt.u32.totalorder %s1082_s19, %s1278_s4 }
  0x17   :  { %p1088_p10 = pnand %p1086_p9, %p1083_p8 }
  0x19   :  { %1091 = shalt.err (!%p1088_p10)
}
  0x1a   :  { %s1092_s24 = scalar_lea.vmem %s39_s16, 3072  ;;  %p1097_p12 = scmp.lt.s32.totalorder %s39_s16, %s39_s16 }
  0x1b   :  { %p1093_p11 = scmp.ne.s32.totalorder %s39_s16, %s1092_s24  ;;  %p1098_p13 = scmp.lt.s32.totalorder %s1092_s24, %s1092_s24 }
  0x1d   :  { %p1099_p0 = por %p1098_p13, %p1097_p12 }
  0x1f   :  { %p1100_p1 = pnand %p1099_p0, %p1093_p11 }
  0x21   :  { %1103 = shalt.err (!%p1100_p1)
}
  0x22   :  { %44 = dma.hbm_to_vmem [thread:$0]  %s1278_s4, 3072, %s39_s16, [#allocation6], %s1133_s11, %s1133_s11, %s1134_s12  }
  0x23   :  { %1126 = dma.done.wait [#allocation3], 3072  }
  0x24   :  { %1127 = vsyncadd [#allocation3], 4294964224 }
  0x25   :  { %1128 = dma.done.wait [#allocation6], 3072  }
  0x26   :  { %1129 = vsyncadd [#allocation6], 4294964224  ;;  %v1206_v0 = vld [vmem:[%s1275_s1] sm:$0xff]   ;;  %vm78_vm0 = vcmask 130048   ;;  %v1217_v2 = vld [vmem:[%s1274_s0 + $0x8] sm:$0xff]   ;;  %v1136_v5 = vmov 0.0  }
  0x27   :  { %v1211_v1 = vld [vmem:[%s1274_s0] sm:$0xff]   ;;  %944 = vmatprep.subr.bf16.mxu0 %v1206_v0  ;;  %v1015_v7 = vld [vmem:[#allocation2 + $0x48] sm:$0xff]   ;;  %v1018_v10 = vld [vmem:[#allocation2 + $0x50] sm:$0xff]   ;;  %vm1137_vm1 = vmmov 0  }
  0x28   :  { %945 = vmatpush3.bf16.msra.mxu0 %v1206_v0  ;;  %946 = vmatprep.mubr.msk.bf16.mxu0 %vm78_vm0, %v1211_v1  ;;  %v1012_v3 = vld [vmem:[#allocation2 + $0x40] sm:$0xff]   ;;  %v1016_v8 = vld [vmem:[#allocation2 + $0x8] sm:$0xff]   ;;  %v1019_v11 = vld [vmem:[#allocation2 + $0x10] sm:$0xff]  }
  0x29   :  { %v1013_v4 = vld [vmem:[#allocation2] sm:$0xff]   ;;  %950 = vmatprep.subr.bf16.mxu0 %v1136_v5  ;;  %877 = vmatprep.subr.bf16.mxu1 %v1012_v3  ;;  %v1017_v9 = vld [vmem:[#allocation2 + $0x88] sm:$0xff]   ;;  %v1020_v12 = vld [vmem:[#allocation2 + $0x90] sm:$0xff]  }
  0x2a   :  { %v1014_v6 = vld [vmem:[#allocation2 + $0x80] sm:$0xff]   ;;  %878 = vmatpush3.bf16.msra.mxu1 %v1013_v4  ;;  %v1021_v13 = vld [vmem:[#allocation2 + $0x58] sm:$0xff]   ;;  %v1027_v19 = vld [vmem:[#allocation2 + $0x68] sm:$0xff]  }
  0x2b   :  { %947 = vmatmul.mubr.msk.bf16.vlgmr.msra.gmra.mrb[0].mxu0 %vm78_vm0, %v1217_v2  ;;  %879 = vmatprep.subr.bf16.mxu1 %v1015_v7  ;;  %v1022_v14 = vld [vmem:[#allocation2 + $0x18] sm:$0xff]   ;;  %v1024_v16 = vld [vmem:[#allocation2 + $0x60] sm:$0xff]   ;;  %v1028_v20 = vld [vmem:[#allocation2 + $0x28] sm:$0xff]  }
  0x2c   :  { %951 = vmatpush3.bf16.msra.mxu0 %v1014_v6  ;;  %v1023_v15 = vld [vmem:[#allocation2 + $0x98] sm:$0xff]   ;;  %v1025_v17 = vld [vmem:[#allocation2 + $0x20] sm:$0xff]   ;;  %v1029_v21 = vld [vmem:[#allocation2 + $0xa8] sm:$0xff]   ;;  %966 = vmatprep.mubr.msk.bf16.mxu0 %vm1137_vm1, %v1136_v5 }
  0x2d   :  { %952 = vmatprep.subr.bf16.mxu0 %v1136_v5  ;;  %v1026_v18 = vld [vmem:[#allocation2 + $0xa0] sm:$0xff]   ;;  %v1030_v22 = vld [vmem:[#allocation2 + $0x70] sm:$0xff]   ;;  %v1033_v25 = vld [vmem:[#allocation2 + $0x78] sm:$0xff]  }
  0x2e   :  { %880 = vmatpush3.bf16.msra.mxu1 %v1016_v8  ;;  %v1031_v23 = vld [vmem:[#allocation2 + $0x30] sm:$0xff]   ;;  %v1034_v26 = vld [vmem:[#allocation2 + $0x38] sm:$0xff]   ;;  %v1044_v38 = vld [vmem:[#allocation5 + $0x40] sm:$0xff]  }
  0x2f   :  { %881 = vmatprep.subr.bf16.mxu1 %v1018_v10  ;;  %v1032_v24 = vld [vmem:[#allocation2 + $0xb0] sm:$0xff]   ;;  %v1035_v27 = vld [vmem:[#allocation2 + $0xb8] sm:$0xff]   ;;  %v1045_v39 = vld [vmem:[#allocation5] sm:$0xff]  }
  0x30   :  { %953 = vmatpush3.bf16.msra.mxu0 %v1017_v9  ;;  %v1046_v40 = vld [vmem:[#allocation5 + $0x48] sm:$0xff]   ;;  %v1048_v42 = vld [vmem:[#allocation5 + $0x50] sm:$0xff]   ;;  %v1050_v44 = vld [vmem:[#allocation5 + $0x58] sm:$0xff]  }
  0x31   :  { %954 = vmatprep.subr.bf16.mxu0 %v1136_v5  ;;  %v1047_v41 = vld [vmem:[#allocation5 + $0x8] sm:$0xff]   ;;  %v1049_v43 = vld [vmem:[#allocation5 + $0x10] sm:$0xff]   ;;  %v1051_v45 = vld [vmem:[#allocation5 + $0x18] sm:$0xff]  }
  0x32   :  { %882 = vmatpush3.bf16.msra.mxu1 %v1019_v11  ;;  %v1052_v46 = vld [vmem:[#allocation5 + $0x60] sm:$0xff]   ;;  %v1054_v48 = vld [vmem:[#allocation5 + $0x68] sm:$0xff]   ;;  %v1056_v50 = vld [vmem:[#allocation5 + $0x70] sm:$0xff]  }
  0x33   :  { %883 = vmatprep.subr.bf16.mxu1 %v1021_v13  ;;  %v1053_v47 = vld [vmem:[#allocation5 + $0x20] sm:$0xff]   ;;  %v1055_v49 = vld [vmem:[#allocation5 + $0x28] sm:$0xff]   ;;  %v1057_v51 = vld [vmem:[#allocation5 + $0x30] sm:$0xff]  }
  0x34   :  { %955 = vmatpush3.bf16.msra.mxu0 %v1020_v12  ;;  %v821_v54 = vld [vmem:[%s1277_s3] ss:$0 sm:$0xff]  ;;  %v1037_v4 = vld [vmem:[#allocation5 + $0x88] sm:$0xff]   ;;  %v1038_v6 = vld [vmem:[#allocation5 + $0x90] sm:$0xff]  }
  0x35   :  { %956 = vmatprep.subr.bf16.mxu0 %v1136_v5  ;;  %v1036_v3 = vld [vmem:[#allocation5 + $0x80] sm:$0xff]   ;;  %v1039_v7 = vld [vmem:[#allocation5 + $0x98] sm:$0xff]   ;;  %v1042_v9 = vld [vmem:[#allocation5 + $0xb0] sm:$0xff]  }
  0x36   :  { %884 = vmatpush3.bf16.msra.mxu1 %v1022_v14  ;;  %v1040_v8 = vld [vmem:[#allocation5 + $0xa0] sm:$0xff]   ;;  %v1043_v10 = vld [vmem:[#allocation5 + $0xb8] sm:$0xff]  }
  0x37   :  { %885 = vmatprep.subr.bf16.mxu1 %v1024_v16  ;;  %v1058_v11 = vld [vmem:[#allocation5 + $0x78] sm:$0xff]  }
  0x38   :  { %957 = vmatpush3.bf16.msra.mxu0 %v1023_v15  ;;  %v1059_v12 = vld [vmem:[#allocation5 + $0x38] sm:$0xff]  }
  0x39   :  { %958 = vmatprep.subr.bf16.mxu0 %v1136_v5 }
  0x3a   :  { %886 = vmatpush3.bf16.msra.mxu1 %v1025_v17 }
  0x3b   :  { %887 = vmatprep.subr.bf16.mxu1 %v1027_v19 }
  0x3c   :  { %959 = vmatpush3.bf16.msra.mxu0 %v1026_v18 }
  0x3d   :  { %960 = vmatprep.subr.bf16.mxu0 %v1136_v5 }
  0x3e   :  { %888 = vmatpush3.bf16.msra.mxu1 %v1028_v20 }
  0x3f   :  { %889 = vmatprep.subr.bf16.mxu1 %v1030_v22 }
  0x40   :  { %961 = vmatpush3.bf16.msra.mxu0 %v1029_v21 }
  0x41   :  { %962 = vmatprep.subr.bf16.mxu0 %v1136_v5 }
  0x42   :  { %890 = vmatpush3.bf16.msra.mxu1 %v1031_v23 }
  0x43   :  { %891 = vmatprep.subr.bf16.mxu1 %v1033_v25 }
  0x44   :  { %963 = vmatpush3.bf16.msra.mxu0 %v1032_v24  ;;  %v848_v24 = vld [vmem:[%s1279_s5] ss:$0 sm:$0xff]  ;;  %s1138_s5 = smov [#allocation7]  }
  0x45   :  { %964 = vmatprep.subr.bf16.mxu0 %v1136_v5  ;;  %s806_s11 = sshll.u32 %s1138_s5, 4  ;;  %s807_s11 = int_to_ptr.vmem [resolvable:$true] %s806_s11 }
  0x46   :  { %892 = vmatpush3.bf16.msra.mxu1 %v1034_v26  ;;  %s1104_s12 = scalar_lea.vmem %s807_s11, 128  ;;  %p1109_p3 = scmp.lt.s32.totalorder %s807_s11, %s807_s11 }
  0x47   :  { %p1105_p2 = scmp.ne.s32.totalorder %s807_s11, %s1104_s12  ;;  %p1110_p4 = scmp.lt.s32.totalorder %s1104_s12, %s1104_s12 }
  0x48   :  { %965 = vmatpush3.bf16.msra.mxu0 %v1035_v27 }
  0x49   :  { %911 = vmatprep.subr.bf16.mxu0 %v1044_v38  ;;  %p1111_p5 = por %p1110_p4, %p1109_p3 }
  0x4b   :  { %967 = vmatmul.mubr.bf16.vlgmr.msra.gmra.mrb[4].mxu0 %v1206_v0  ;;  %p1112_p6 = pnand %p1111_p5, %p1105_p2 }
  0x4c   :  { %912 = vmatpush3.bf16.msra.mxu0 %v1045_v39 }
  0x4d   :  { %913 = vmatprep.subr.bf16.mxu0 %v1046_v40 }
  0x50   :  { %914 = vmatpush3.bf16.msra.mxu0 %v1047_v41 }
  0x51   :  { %915 = vmatprep.subr.bf16.mxu0 %v1048_v42 }
  0x54   :  { %916 = vmatpush3.bf16.msra.mxu0 %v1049_v43 }
  0x55   :  { %917 = vmatprep.subr.bf16.mxu0 %v1050_v44 }
  0x58   :  { %918 = vmatpush3.bf16.msra.mxu0 %v1051_v45 }
  0x59   :  { %919 = vmatprep.subr.bf16.mxu0 %v1052_v46 }
  0x5c   :  { %920 = vmatpush3.bf16.msra.mxu0 %v1053_v47 }
  0x5d   :  { %921 = vmatprep.subr.bf16.mxu0 %v1054_v48 }
  0x60   :  { %922 = vmatpush3.bf16.msra.mxu0 %v1055_v49 }
  0x61   :  { %923 = vmatprep.subr.bf16.mxu0 %v1056_v50 }
  0x64   :  { %924 = vmatpush3.bf16.msra.mxu0 %v1057_v51 }
  0x65   :  { %925 = vmatprep.subr.bf16.mxu0 %v1058_v11 }
  0x68   :  { %926 = vmatpush3.bf16.msra.mxu0 %v1059_v12 }
  0x69   :  { %996 = vmatprep.subr.bf16.mxu0 %v1136_v5 }
  0xfe   :  { %v948_v28 = vpop.f32.mrb[0].mxu0 }
  0xff   :  { %v119_v29 = vpop.f32.mrb[1].mxu0 }
 0x100   :  { %v949_v30 = vpop.f32.mrb[2].mxu0 }
 0x101   :  { %v122_v31 = vpop.f32.mrb[3].mxu0  ;;  %v135_v32 = vpack.c.bf16 %v949_v30, %v948_v28 }
 0x102   :  { %v134_v33 = vpack.c.bf16 %v122_v31, %v119_v29 }
 0x103   :  { %367 = vmatprep.mubr.bf16.mxu1 %v135_v32 }
 0x104   :  { %368 = vmatmul.mubr.bf16.vlgmr.msra.gmra.mrb[0].mxu1 %v134_v33 }
 0x105   :  { %972 = vmatprep.mubr.msk.bf16.mxu1 %vm78_vm0, %v1211_v1 }
 0x11e   :  { %v410_v34 = vpop.f32.mrb[4].mxu0 }
 0x11f   :  { %v968_v35 = vpop.f32.mrb[5].mxu0 }
 0x120   :  { %v413_v36 = vpop.f32.mrb[6].mxu0 }
 0x121   :  { %v969_v37 = vpop.f32.mrb[7].mxu0 }
 0x1d7   :  { %v893_v52 = vpop.f32.mrb[0].mxu1 }
 0x1d8   :  { %v894_v53 = vpop.f32.mrb[1].mxu1 }
 0x1d9   :  { %v895_v55 = vadd.f32 %v894_v53, %v893_v52  ;;  %v896_v56 = vpop.f32.mrb[2].mxu1 }
 0x1da   :  { %v897_v57 = vpop.f32.mrb[3].mxu1 }
 0x1db   :  { %v370_v58 = vadd.f32 %v895_v55, %v821_v54  ;;  %v898_v59 = vadd.f32 %v897_v57, %v896_v56 }
 0x1dd   :  { %v411_v60 = vadd.f32 %v410_v34, %v370_v58  ;;  %v373_v61 = vadd.f32 %v898_v59, %v821_v54 }
 0x1df   :  { %v414_v62 = vadd.f32 %v413_v36, %v373_v61  ;;  %v417_v63 = vmax.f32 %v411_v60, 0.0  ;;  %v754_v36 = vld [vmem:[%s1280_s6] sm:$0xf] }
 0x1e1   :  { %v418_v0 = vmax.f32 %v414_v62, 0.0 }
 0x1e3   :  { %v419_v1 = vpack.c.bf16 %v418_v0, %v417_v63 }
 0x1e5   :  { %970 = vmatprep.subr.bf16.mxu1 %v419_v1 }
 0x1e6   :  { %971 = vmatpush3.bf16.msra.mxu1 %v419_v1 }
 0x1e7   :  { %976 = vmatprep.subr.bf16.mxu1 %v1136_v5 }
 0x1e9   :  { %973 = vmatmul.mubr.msk.bf16.vlgmr.msra.gmra.mrb[4].mxu1 %vm78_vm0, %v1217_v2  ;;  %v1041_v2 = vld [vmem:[#allocation5 + $0xa8] sm:$0xff]  }
 0x1ea   :  { %977 = vmatpush3.bf16.msra.mxu1 %v1036_v3  ;;  %992 = vmatprep.mubr.msk.bf16.mxu1 %vm1137_vm1, %v1136_v5 }
 0x1eb   :  { %978 = vmatprep.subr.bf16.mxu1 %v1136_v5 }
 0x1ee   :  { %979 = vmatpush3.bf16.msra.mxu1 %v1037_v4 }
 0x1ef   :  { %980 = vmatprep.subr.bf16.mxu1 %v1136_v5 }
 0x1f2   :  { %981 = vmatpush3.bf16.msra.mxu1 %v1038_v6 }
 0x1f3   :  { %982 = vmatprep.subr.bf16.mxu1 %v1136_v5 }
 0x1f6   :  { %983 = vmatpush3.bf16.msra.mxu1 %v1039_v7 }
 0x1f7   :  { %984 = vmatprep.subr.bf16.mxu1 %v1136_v5 }
 0x1fa   :  { %985 = vmatpush3.bf16.msra.mxu1 %v1040_v8 }
 0x1fb   :  { %986 = vmatprep.subr.bf16.mxu1 %v1136_v5 }
 0x1fe   :  { %987 = vmatpush3.bf16.msra.mxu1 %v1041_v2 }
 0x1ff   :  { %988 = vmatprep.subr.bf16.mxu1 %v1136_v5 }
 0x202   :  { %989 = vmatpush3.bf16.msra.mxu1 %v1042_v9 }
 0x203   :  { %990 = vmatprep.subr.bf16.mxu1 %v1136_v5 }
 0x206   :  { %991 = vmatpush3.bf16.msra.mxu1 %v1043_v10 }
 0x209   :  { %993 = vmatmul.mubr.bf16.vlgmr.msra.gmra.mrb[8].mxu1 %v419_v1 }
 0x2bc   :  { %v974_v13 = vpop.f32.mrb[4].mxu1 }
 0x2bd   :  { %v454_v14 = vpop.f32.mrb[5].mxu1 }
 0x2be   :  { %v975_v15 = vpop.f32.mrb[6].mxu1 }
 0x2bf   :  { %v470_v16 = vpack.c.bf16 %v975_v15, %v974_v13  ;;  %v457_v17 = vpop.f32.mrb[7].mxu1 }
 0x2c0   :  { %v469_v18 = vpack.c.bf16 %v457_v17, %v454_v14 }
 0x2c1   :  { %702 = vmatprep.mubr.bf16.mxu0 %v470_v16 }
 0x2c2   :  { %703 = vmatmul.mubr.bf16.vlgmr.msra.gmra.mrb[8].mxu0 %v469_v18 }
 0x2c3   :  { %998 = vmatprep.mubr.msk.bf16.mxu0 %vm1137_vm1, %v1136_v5 }
 0x2dc   :  { %v745_v19 = vpop.f32.mrb[8].mxu1 }
 0x2dd   :  { %v994_v20 = vpop.f32.mrb[9].mxu1 }
 0x2de   :  { %v748_v21 = vpop.f32.mrb[10].mxu1 }
 0x2df   :  { %v995_v22 = vpop.f32.mrb[11].mxu1 }
 0x395   :  { %v927_v23 = vpop.f32.mrb[8].mxu0 }
 0x396   :  { %v928_v25 = vpop.f32.mrb[9].mxu0 }
 0x397   :  { %v929_v26 = vadd.f32 %v928_v25, %v927_v23  ;;  %v930_v27 = vpop.f32.mrb[10].mxu0 }
 0x398   :  { %v931_v28 = vpop.f32.mrb[11].mxu0 }
 0x399   :  { %v705_v29 = vadd.f32 %v929_v26, %v848_v24  ;;  %v932_v30 = vadd.f32 %v931_v28, %v930_v27 }
 0x39b   :  { %v746_v31 = vadd.f32 %v745_v19, %v705_v29  ;;  %v708_v32 = vadd.f32 %v932_v30, %v848_v24 }
 0x39d   :  { %v749_v33 = vadd.f32 %v748_v21, %v708_v32  ;;  %v752_v34 = vmax.f32 %v746_v31, 0.0 }
 0x39f   :  { %v753_v5 = vmax.f32 %v749_v33, 0.0 }
 0x3a1   :  { %v755_v35 = vpack.c.bf16 %v753_v5, %v752_v34 }
 0x3a3   :  { %997 = vmatpush3.bf16.msra.mxu0 %v755_v35 }
 0x3a6   :  { %999 = vmatmul.mubr.msk.bf16.vlgmr.msra.gmra.mrb[12].mxu0 %vm78_vm0, %v754_v36 }
 0x479   :  { %v793_v37 = vpop.f32.mrb[12].mxu0 }
 0x47a   :  { %799 = vst [vmem:[#allocation7] sm:$0xff] %v793_v37  ;;  %v1000_v38 = vpop.f32.mrb[13].mxu0 }
 0x47b   :  { %v796_v39 = vpop.f32.mrb[14].mxu0 }
 0x47c   :  { %1115 = shalt.err (!%p1112_p6)
}
 0x47d   :  { %s1116_s6 = scalar_lea.hbm %s1281_s7, 128 }
 0x47e   :  { %p1117_p7 = scmp.ne.s32.totalorder %s1281_s7, %s1116_s6  ;;  %p1120_p8 = scmp.lt.u32.totalorder %s1116_s6, %s1281_s7 }
 0x480   :  { %p1122_p9 = pnand %p1120_p8, %p1117_p7 }
 0x482   :  { %1125 = shalt.err (!%p1122_p9)
}
 0x483   :  { %809 = dma.vmem_to_hbm [thread:$0]  %s807_s11, 128, %s1281_s7, [#allocation4]   ;;  %v1001_v40 = vpop.f32.mrb[15].mxu0 }
 0x484   :  { %1130 = dma.done.wait [#allocation4], 128  }
 0x485   :  { %1131 = vsyncadd [#allocation4], 4294967168 }
 0x486   :  { %813 = vsyncpa [#allocation3], 1 }
 0x487   :  { %814 = vsyncpa [#allocation6], 1 }
 0x488   :  { %815 = vsyncpa [#allocation4], 1 }

</bundles_post_ra>
